<compile_context>
chip_gen: v6e
topology: v6e:2x2x1
jax: 0.10.0
libtpu: 0.0.40
codegen_flags: <defaults>
</compile_context>

<pallas_src>
import functools
import math

import jax
import jax.numpy as jnp
import numpy as np
from jax.experimental import pallas as pl
from jax.experimental.pallas import tpu as pltpu


# ---------------------------------------------------------------------------
# In-kernel helpers
# ---------------------------------------------------------------------------

def _residual_layernorm(x, res, gamma, beta, eps=1e-5):
    # LayerNorm(x + res) over last dim (f32 statistics), PyTorch eps=1e-5.
    y = x + res
    mean = jnp.mean(y, axis=-1, keepdims=True)
    c = y - mean
    var = jnp.mean(c * c, axis=-1, keepdims=True)
    return c * jax.lax.rsqrt(var + eps) * gamma + beta


# ---------------------------------------------------------------------------
# Fused multi-head-attention block kernel
#   (QKV projections + per-head scaled-dot-attention + out projection
#    + residual + LayerNorm), one batch element per grid step.
# ---------------------------------------------------------------------------

def _mha_block_kernel(qsrc_ref, ksrc_ref, vsrc_ref, res_ref,
                      wq_ref, wk_ref, wv_ref, wo_ref,
                      bq_ref, bk_ref, bv_ref, bo_ref,
                      g_ref, beta_ref, o_ref, *, nhead, scale):
    xq = qsrc_ref[0]                      # (L, D)
    xk = ksrc_ref[0]                      # (S, D)
    xv = vsrc_ref[0]                      # (S, D)

    # Projections (single dispatch for the whole block; MXU matmuls).
    q = jnp.dot(xq, wq_ref[...], preferred_element_type=jnp.float32) + bq_ref[...]
    k = jnp.dot(xk, wk_ref[...], preferred_element_type=jnp.float32) + bk_ref[...]
    v = jnp.dot(xv, wv_ref[...], preferred_element_type=jnp.float32) + bv_ref[...]

    # Fold the 1/sqrt(dh) scale in once (not per head / per element later).
    q = q * scale

    D = q.shape[-1]
    dh = D // nhead

    # All heads inside this single kernel invocation; static lane slices,
    # no HBM round-trips and no dh-wide external transposes.
    head_outs = []
    for h in range(nhead):
        sl = slice(h * dh, (h + 1) * dh)
        qh = q[:, sl]                                                   # (L, dh)
        kh = k[:, sl]                                                   # (S, dh)
        vh = v[:, sl]                                                   # (S, dh)
        s = jnp.dot(qh, kh.T, preferred_element_type=jnp.float32)       # (L, S)
        m = jnp.max(s, axis=-1, keepdims=True)
        p = jnp.exp(s - m)
        denom = jnp.sum(p, axis=-1, keepdims=True)
        p = p * pl.reciprocal(denom, approx=False)                      # EUP slot
        head_outs.append(jnp.dot(p, vh, preferred_element_type=jnp.float32))

    attn = jnp.concatenate(head_outs, axis=-1)                          # (L, D) lane-dense

    # Output projection + residual + LayerNorm, all fused.
    o = jnp.dot(attn, wo_ref[...], preferred_element_type=jnp.float32) + bo_ref[...]
    out = _residual_layernorm(o, res_ref[0], g_ref[...], beta_ref[...])
    o_ref[0] = out.astype(o_ref.dtype)


def mha_block(q_src, k_src, v_src, residual, p, gamma, beta, nhead):
    """q_src/residual: (B, L, D); k_src/v_src: (B, S, D) -> (B, L, D)."""
    B, L, D = q_src.shape
    S = k_src.shape[1]
    scale = 1.0 / math.sqrt(D // nhead)
    row = lambda a: a.reshape(1, -1)

    kernel = functools.partial(_mha_block_kernel, nhead=nhead, scale=scale)
    return pl.pallas_call(
        kernel,
        out_shape=jax.ShapeDtypeStruct((B, L, D), q_src.dtype),
        grid=(B,),
        in_specs=[
            pl.BlockSpec((1, L, D), lambda b: (b, 0, 0)),   # q source
            pl.BlockSpec((1, S, D), lambda b: (b, 0, 0)),   # k source
            pl.BlockSpec((1, S, D), lambda b: (b, 0, 0)),   # v source
            pl.BlockSpec((1, L, D), lambda b: (b, 0, 0)),   # residual
            pl.BlockSpec((D, D), lambda b: (0, 0)),         # wq (resident)
            pl.BlockSpec((D, D), lambda b: (0, 0)),         # wk
            pl.BlockSpec((D, D), lambda b: (0, 0)),         # wv
            pl.BlockSpec((D, D), lambda b: (0, 0)),         # wo
            pl.BlockSpec((1, D), lambda b: (0, 0)),         # bq
            pl.BlockSpec((1, D), lambda b: (0, 0)),         # bk
            pl.BlockSpec((1, D), lambda b: (0, 0)),         # bv
            pl.BlockSpec((1, D), lambda b: (0, 0)),         # bo
            pl.BlockSpec((1, D), lambda b: (0, 0)),         # ln gamma
            pl.BlockSpec((1, D), lambda b: (0, 0)),         # ln beta
        ],
        out_specs=pl.BlockSpec((1, L, D), lambda b: (b, 0, 0)),
        compiler_params=pltpu.CompilerParams(dimension_semantics=("parallel",)),
    )(q_src, k_src, v_src, residual,
      p["wq"], p["wk"], p["wv"], p["wo"],
      row(p["bq"]), row(p["bk"]), row(p["bv"]), row(p["bo"]),
      row(gamma), row(beta))


# ---------------------------------------------------------------------------
# Fused FFN block kernel: linear1 + ReLU + linear2 + residual + LayerNorm.
# ---------------------------------------------------------------------------

def _ffn_block_kernel(x_ref, w1_ref, b1_ref, w2_ref, b2_ref, g_ref, beta_ref, o_ref):
    x = x_ref[0]                                                         # (L, D)
    h = jnp.dot(x, w1_ref[...], preferred_element_type=jnp.float32) + b1_ref[...]
    h = jnp.maximum(h, 0.0)                                              # ReLU
    y = jnp.dot(h, w2_ref[...], preferred_element_type=jnp.float32) + b2_ref[...]
    out = _residual_layernorm(y, x, g_ref[...], beta_ref[...])
    o_ref[0] = out.astype(o_ref.dtype)


def ffn_block(x, w1, b1, w2, b2, gamma, beta):
    """x: (B, L, D) -> (B, L, D)."""
    B, L, D = x.shape
    F = w1.shape[1]
    row = lambda a: a.reshape(1, -1)
    return pl.pallas_call(
        _ffn_block_kernel,
        out_shape=jax.ShapeDtypeStruct((B, L, D), x.dtype),
        grid=(B,),
        in_specs=[
            pl.BlockSpec((1, L, D), lambda b: (b, 0, 0)),   # x / residual
            pl.BlockSpec((D, F), lambda b: (0, 0)),         # w1 (resident)
            pl.BlockSpec((1, F), lambda b: (0, 0)),         # b1
            pl.BlockSpec((F, D), lambda b: (0, 0)),         # w2
            pl.BlockSpec((1, D), lambda b: (0, 0)),         # b2
            pl.BlockSpec((1, D), lambda b: (0, 0)),         # ln gamma
            pl.BlockSpec((1, D), lambda b: (0, 0)),         # ln beta
        ],
        out_specs=pl.BlockSpec((1, L, D), lambda b: (b, 0, 0)),
        compiler_params=pltpu.CompilerParams(dimension_semantics=("parallel",)),
    )(x, w1, row(b1), w2, row(b2), row(gamma), row(beta))


# ---------------------------------------------------------------------------
# Layer composition (forward_post).  Only glue outside the kernels is the
# single seq-first <-> batch-first relayout at the layer boundary and the
# optional pos-embed adds.
# ---------------------------------------------------------------------------

def transformer_decoder_layer(tgt, memory, params, nhead, pos=None, query_pos=None):
    """forward_post: self-attn -> add&norm -> cross-attn -> add&norm -> FFN -> add&norm."""
    def wpe(t, e):
        return t if e is None else t + e

    # To batch-first once (lane dim stays d_model; done once per layer).
    tgt_b = jnp.transpose(tgt, (1, 0, 2))                                # (B, L, D)
    mem_b = jnp.transpose(memory, (1, 0, 2))                             # (B, S, D)
    qp_b = None if query_pos is None else jnp.transpose(query_pos, (1, 0, 2))
    pos_b = None if pos is None else jnp.transpose(pos, (1, 0, 2))

    # --- self attention + add & norm (one fused kernel) ---
    qk = wpe(tgt_b, qp_b)
    x = mha_block(qk, qk, tgt_b, tgt_b, params["self_attn"],
                  params["norm1_g"], params["norm1_b"], nhead)

    # --- cross attention + add & norm (one fused kernel) ---
    x = mha_block(wpe(x, qp_b), wpe(mem_b, pos_b), mem_b, x, params["cross_attn"],
                  params["norm2_g"], params["norm2_b"], nhead)

    # --- feed forward + add & norm (one fused kernel) ---
    x = ffn_block(x, params["w1"], params["b1"], params["w2"], params["b2"],
                  params["norm3_g"], params["norm3_b"])

    return jnp.transpose(x, (1, 0, 2))                                   # back to (L, B, D)


# ---------------------------------------------------------------------------
# Deterministic parameter init (synthetic; shapes match nn.Module __init__)
# ---------------------------------------------------------------------------

def init_params(key, d_model, nhead, dim_feedforward):
    keys = iter(jax.random.split(key, 32))

    def w(shape, scale=0.05):
        return jax.random.normal(next(keys), shape, jnp.float32) * scale

    def mha():
        return dict(
            wq=w((d_model, d_model)), bq=w((d_model,)),
            wk=w((d_model, d_model)), bk=w((d_model,)),
            wv=w((d_model, d_model)), bv=w((d_model,)),
            wo=w((d_model, d_model)), bo=w((d_model,)),
        )

    return dict(
        self_attn=mha(),
        cross_attn=mha(),
        w1=w((d_model, dim_feedforward)), b1=w((dim_feedforward,)),
        w2=w((dim_feedforward, d_model)), b2=w((d_model,)),
        norm1_g=jnp.ones((d_model,), jnp.float32), norm1_b=jnp.zeros((d_model,), jnp.float32),
        norm2_g=jnp.ones((d_model,), jnp.float32), norm2_b=jnp.zeros((d_model,), jnp.float32),
        norm3_g=jnp.ones((d_model,), jnp.float32), norm3_b=jnp.zeros((d_model,), jnp.float32),
    )


# ---------------------------------------------------------------------------
# Pure-JAX reference (mirrors PyTorch semantics, eval mode / no dropout)
# ---------------------------------------------------------------------------

def _ref_mha(query, key, value, p, nhead):
    L, B, D = query.shape
    S = key.shape[0]
    dh = D // nhead
    q = query.reshape(L * B, D) @ p["wq"] + p["bq"]
    k = key.reshape(S * B, D) @ p["wk"] + p["bk"]
    v = value.reshape(S * B, D) @ p["wv"] + p["bv"]
    q = q.reshape(L, B * nhead, dh).transpose(1, 0, 2) * (1.0 / math.sqrt(dh))
    k = k.reshape(S, B * nhead, dh).transpose(1, 0, 2)
    v = v.reshape(S, B * nhead, dh).transpose(1, 0, 2)
    s = jnp.einsum("bld,bsd->bls", q, k)
    a = jax.nn.softmax(s, axis=-1)
    o = jnp.einsum("bls,bsd->bld", a, v)
    o = o.transpose(1, 0, 2).reshape(L * B, D) @ p["wo"] + p["bo"]
    return o.reshape(L, B, D)


def _ref_ln(x, g, b):
    m = jnp.mean(x, axis=-1, keepdims=True)
    v = jnp.mean((x - m) ** 2, axis=-1, keepdims=True)
    return (x - m) / jnp.sqrt(v + 1e-5) * g + b


def ref_decoder_layer(tgt, memory, params, nhead, pos, query_pos):
    qk = tgt + query_pos
    tgt2 = _ref_mha(qk, qk, tgt, params["self_attn"], nhead)
    tgt = _ref_ln(tgt + tgt2, params["norm1_g"], params["norm1_b"])
    tgt2 = _ref_mha(tgt + query_pos, memory + pos, memory, params["cross_attn"], nhead)
    tgt = _ref_ln(tgt + tgt2, params["norm2_g"], params["norm2_b"])
    h = jnp.maximum(tgt @ params["w1"] + params["b1"], 0.0)
    tgt2 = h @ params["w2"] + params["b2"]
    tgt = _ref_ln(tgt + tgt2, params["norm3_g"], params["norm3_b"])
    return tgt


# ---------------------------------------------------------------------------

if __name__ == "__main__":
    d_model, nhead, dim_feedforward = 32, 4, 64
    L, S, B = 8, 12, 2

    key = jax.random.PRNGKey(0)
    k_tgt, k_mem, k_qp, k_pos, k_par = jax.random.split(key, 5)

    tgt = jax.random.normal(k_tgt, (L, B, d_model), jnp.float32)
    memory = jax.random.normal(k_mem, (S, B, d_model), jnp.float32)
    query_pos = jax.random.normal(k_qp, (L, B, d_model), jnp.float32)
    pos = jax.random.normal(k_pos, (S, B, d_model), jnp.float32)

    params = init_params(k_par, d_model, nhead, dim_feedforward)

    out = transformer_decoder_layer(tgt, memory, params, nhead,
                                    pos=pos, query_pos=query_pos)
    out = jax.block_until_ready(out)

    ref = ref_decoder_layer(tgt, memory, params, nhead, pos, query_pos)
    np.testing.assert_allclose(np.asarray(out), np.asarray(ref), rtol=2e-5, atol=2e-5)

    print("KERNEL_OK")
</pallas_src>

<mosaic_0001>
module attributes {stable_mosaic.version = 11 : i64} {
  func.func @_mha_block_kernel(%arg0: i32, %arg1: memref<1x8x32xf32, #tpu.memory_space<vmem>>, %arg2: memref<1x8x32xf32, #tpu.memory_space<vmem>>, %arg3: memref<1x8x32xf32, #tpu.memory_space<vmem>>, %arg4: memref<1x8x32xf32, #tpu.memory_space<vmem>>, %arg5: memref<32x32xf32, #tpu.memory_space<vmem>>, %arg6: memref<32x32xf32, #tpu.memory_space<vmem>>, %arg7: memref<32x32xf32, #tpu.memory_space<vmem>>, %arg8: memref<32x32xf32, #tpu.memory_space<vmem>>, %arg9: memref<1x32xf32, #tpu.memory_space<vmem>>, %arg10: memref<1x32xf32, #tpu.memory_space<vmem>>, %arg11: memref<1x32xf32, #tpu.memory_space<vmem>>, %arg12: memref<1x32xf32, #tpu.memory_space<vmem>>, %arg13: memref<1x32xf32, #tpu.memory_space<vmem>>, %arg14: memref<1x32xf32, #tpu.memory_space<vmem>>, %arg15: memref<1x8x32xf32, #tpu.memory_space<vmem>>) attributes {dimension_semantics = [#tpu.dimension_semantics<parallel>], iteration_bounds = array<i64: 2>, scalar_prefetch = 0 : i64, scratch_operands = 0 : i64, tpu.core_type = #tpu.core_type<tc>, window_params = [{transform_indices = @transform_0, window_bounds = array<i64: 1, 8, 32>}, {transform_indices = @transform_1, window_bounds = array<i64: 1, 8, 32>}, {transform_indices = @transform_2, window_bounds = array<i64: 1, 8, 32>}, {transform_indices = @transform_3, window_bounds = array<i64: 1, 8, 32>}, {pipeline_mode = #tpu.pipeline_mode<synchronous>, transform_indices = @transform_4, window_bounds = array<i64: 32, 32>}, {pipeline_mode = #tpu.pipeline_mode<synchronous>, transform_indices = @transform_5, window_bounds = array<i64: 32, 32>}, {pipeline_mode = #tpu.pipeline_mode<synchronous>, transform_indices = @transform_6, window_bounds = array<i64: 32, 32>}, {pipeline_mode = #tpu.pipeline_mode<synchronous>, transform_indices = @transform_7, window_bounds = array<i64: 32, 32>}, {pipeline_mode = #tpu.pipeline_mode<synchronous>, transform_indices = @transform_8, window_bounds = array<i64: 1, 32>}, {pipeline_mode = #tpu.pipeline_mode<synchronous>, transform_indices = @transform_9, window_bounds = array<i64: 1, 32>}, {pipeline_mode = #tpu.pipeline_mode<synchronous>, transform_indices = @transform_10, window_bounds = array<i64: 1, 32>}, {pipeline_mode = #tpu.pipeline_mode<synchronous>, transform_indices = @transform_11, window_bounds = array<i64: 1, 32>}, {pipeline_mode = #tpu.pipeline_mode<synchronous>, transform_indices = @transform_12, window_bounds = array<i64: 1, 32>}, {pipeline_mode = #tpu.pipeline_mode<synchronous>, transform_indices = @transform_13, window_bounds = array<i64: 1, 32>}, {transform_indices = @transform_14, window_bounds = array<i64: 1, 8, 32>}]} {
    %c0 = arith.constant 0 : index
    %c0_0 = arith.constant 0 : index
    %c0_1 = arith.constant 0 : index
    %0 = vector.load %arg1[%c0, %c0_0, %c0_1] : memref<1x8x32xf32, #tpu.memory_space<vmem>>, vector<1x8x32xf32>
    %1 = vector.shape_cast %0 : vector<1x8x32xf32> to vector<8x32xf32>
    %c0_2 = arith.constant 0 : index
    %c0_3 = arith.constant 0 : index
    %c0_4 = arith.constant 0 : index
    %2 = vector.load %arg2[%c0_2, %c0_3, %c0_4] : memref<1x8x32xf32, #tpu.memory_space<vmem>>, vector<1x8x32xf32>
    %3 = vector.shape_cast %2 : vector<1x8x32xf32> to vector<8x32xf32>
    %c0_5 = arith.constant 0 : index
    %c0_6 = arith.constant 0 : index
    %c0_7 = arith.constant 0 : index
    %4 = vector.load %arg3[%c0_5, %c0_6, %c0_7] : memref<1x8x32xf32, #tpu.memory_space<vmem>>, vector<1x8x32xf32>
    %5 = vector.shape_cast %4 : vector<1x8x32xf32> to vector<8x32xf32>
    %c0_8 = arith.constant 0 : index
    %c0_9 = arith.constant 0 : index
    %6 = vector.load %arg5[%c0_8, %c0_9] : memref<32x32xf32, #tpu.memory_space<vmem>>, vector<32x32xf32>
    %cst = arith.constant dense<0.000000e+00> : vector<8x32xf32>
    %7 = tpu.matmul %1, %6, %cst {dimension_numbers = #tpu.dot_dimension_numbers<[1], [0], [0], [1], [0, 0, 1, 1], [], []>} : vector<8x32xf32>, vector<32x32xf32>, vector<8x32xf32> -> vector<8x32xf32>
    %c0_10 = arith.constant 0 : index
    %c0_11 = arith.constant 0 : index
    %8 = vector.load %arg9[%c0_10, %c0_11] : memref<1x32xf32, #tpu.memory_space<vmem>>, vector<1x32xf32>
    %9 = vector.broadcast %8 : vector<1x32xf32> to vector<8x32xf32>
    %10 = arith.addf %7, %9 : vector<8x32xf32>
    %c0_12 = arith.constant 0 : index
    %c0_13 = arith.constant 0 : index
    %11 = vector.load %arg6[%c0_12, %c0_13] : memref<32x32xf32, #tpu.memory_space<vmem>>, vector<32x32xf32>
    %cst_14 = arith.constant dense<0.000000e+00> : vector<8x32xf32>
    %12 = tpu.matmul %3, %11, %cst_14 {dimension_numbers = #tpu.dot_dimension_numbers<[1], [0], [0], [1], [0, 0, 1, 1], [], []>} : vector<8x32xf32>, vector<32x32xf32>, vector<8x32xf32> -> vector<8x32xf32>
    %c0_15 = arith.constant 0 : index
    %c0_16 = arith.constant 0 : index
    %13 = vector.load %arg10[%c0_15, %c0_16] : memref<1x32xf32, #tpu.memory_space<vmem>>, vector<1x32xf32>
    %14 = vector.broadcast %13 : vector<1x32xf32> to vector<8x32xf32>
    %15 = arith.addf %12, %14 : vector<8x32xf32>
    %c0_17 = arith.constant 0 : index
    %c0_18 = arith.constant 0 : index
    %16 = vector.load %arg7[%c0_17, %c0_18] : memref<32x32xf32, #tpu.memory_space<vmem>>, vector<32x32xf32>
    %cst_19 = arith.constant dense<0.000000e+00> : vector<8x32xf32>
    %17 = tpu.matmul %5, %16, %cst_19 {dimension_numbers = #tpu.dot_dimension_numbers<[1], [0], [0], [1], [0, 0, 1, 1], [], []>} : vector<8x32xf32>, vector<32x32xf32>, vector<8x32xf32> -> vector<8x32xf32>
    %c0_20 = arith.constant 0 : index
    %c0_21 = arith.constant 0 : index
    %18 = vector.load %arg11[%c0_20, %c0_21] : memref<1x32xf32, #tpu.memory_space<vmem>>, vector<1x32xf32>
    %19 = vector.broadcast %18 : vector<1x32xf32> to vector<8x32xf32>
    %20 = arith.addf %17, %19 : vector<8x32xf32>
    %cst_22 = arith.constant 0.353553385 : f32
    %21 = vector.broadcast %cst_22 : f32 to vector<8x32xf32>
    %22 = arith.mulf %10, %21 : vector<8x32xf32>
    %23 = vector.extract_strided_slice %22 {offsets = [0, 0], sizes = [8, 8], strides = [1, 1]} : vector<8x32xf32> to vector<8x8xf32>
    %24 = vector.extract_strided_slice %15 {offsets = [0, 0], sizes = [8, 8], strides = [1, 1]} : vector<8x32xf32> to vector<8x8xf32>
    %25 = vector.extract_strided_slice %20 {offsets = [0, 0], sizes = [8, 8], strides = [1, 1]} : vector<8x32xf32> to vector<8x8xf32>
    %26 = tpu.transpose %24, [1, 0] : vector<8x8xf32> -> vector<8x8xf32>
    %cst_23 = arith.constant dense<0.000000e+00> : vector<8x8xf32>
    %27 = tpu.matmul %23, %26, %cst_23 {dimension_numbers = #tpu.dot_dimension_numbers<[1], [0], [0], [1], [0, 0, 1, 1], [], []>} : vector<8x8xf32>, vector<8x8xf32>, vector<8x8xf32> -> vector<8x8xf32>
    %cst_24 = arith.constant dense<0xFF800000> : vector<8xf32>
    %28 = vector.multi_reduction <maximumf>, %27, %cst_24 [1] : vector<8x8xf32> to vector<8xf32>
    %29 = vector.shape_cast %28 : vector<8xf32> to vector<8x1xf32>
    %30 = vector.broadcast %29 : vector<8x1xf32> to vector<8x8xf32>
    %31 = arith.subf %27, %30 : vector<8x8xf32>
    %32 = math.exp %31 : vector<8x8xf32>
    %cst_25 = arith.constant dense<0.000000e+00> : vector<8xf32>
    %33 = vector.multi_reduction <add>, %32, %cst_25 [1] : vector<8x8xf32> to vector<8xf32>
    %34 = vector.shape_cast %33 : vector<8xf32> to vector<8x1xf32>
    %35 = tpu.reciprocal %34 : vector<8x1xf32> -> vector<8x1xf32>
    %36 = vector.broadcast %35 : vector<8x1xf32> to vector<8x8xf32>
    %37 = arith.mulf %32, %36 : vector<8x8xf32>
    %cst_26 = arith.constant dense<0.000000e+00> : vector<8x8xf32>
    %38 = tpu.matmul %37, %25, %cst_26 {dimension_numbers = #tpu.dot_dimension_numbers<[1], [0], [0], [1], [0, 0, 1, 1], [], []>} : vector<8x8xf32>, vector<8x8xf32>, vector<8x8xf32> -> vector<8x8xf32>
    %39 = vector.extract_strided_slice %22 {offsets = [0, 8], sizes = [8, 8], strides = [1, 1]} : vector<8x32xf32> to vector<8x8xf32>
    %40 = vector.extract_strided_slice %15 {offsets = [0, 8], sizes = [8, 8], strides = [1, 1]} : vector<8x32xf32> to vector<8x8xf32>
    %41 = vector.extract_strided_slice %20 {offsets = [0, 8], sizes = [8, 8], strides = [1, 1]} : vector<8x32xf32> to vector<8x8xf32>
    %42 = tpu.transpose %40, [1, 0] : vector<8x8xf32> -> vector<8x8xf32>
    %cst_27 = arith.constant dense<0.000000e+00> : vector<8x8xf32>
    %43 = tpu.matmul %39, %42, %cst_27 {dimension_numbers = #tpu.dot_dimension_numbers<[1], [0], [0], [1], [0, 0, 1, 1], [], []>} : vector<8x8xf32>, vector<8x8xf32>, vector<8x8xf32> -> vector<8x8xf32>
    %cst_28 = arith.constant dense<0xFF800000> : vector<8xf32>
    %44 = vector.multi_reduction <maximumf>, %43, %cst_28 [1] : vector<8x8xf32> to vector<8xf32>
    %45 = vector.shape_cast %44 : vector<8xf32> to vector<8x1xf32>
    %46 = vector.broadcast %45 : vector<8x1xf32> to vector<8x8xf32>
    %47 = arith.subf %43, %46 : vector<8x8xf32>
    %48 = math.exp %47 : vector<8x8xf32>
    %cst_29 = arith.constant dense<0.000000e+00> : vector<8xf32>
    %49 = vector.multi_reduction <add>, %48, %cst_29 [1] : vector<8x8xf32> to vector<8xf32>
    %50 = vector.shape_cast %49 : vector<8xf32> to vector<8x1xf32>
    %51 = tpu.reciprocal %50 : vector<8x1xf32> -> vector<8x1xf32>
    %52 = vector.broadcast %51 : vector<8x1xf32> to vector<8x8xf32>
    %53 = arith.mulf %48, %52 : vector<8x8xf32>
    %cst_30 = arith.constant dense<0.000000e+00> : vector<8x8xf32>
    %54 = tpu.matmul %53, %41, %cst_30 {dimension_numbers = #tpu.dot_dimension_numbers<[1], [0], [0], [1], [0, 0, 1, 1], [], []>} : vector<8x8xf32>, vector<8x8xf32>, vector<8x8xf32> -> vector<8x8xf32>
    %55 = vector.extract_strided_slice %22 {offsets = [0, 16], sizes = [8, 8], strides = [1, 1]} : vector<8x32xf32> to vector<8x8xf32>
    %56 = vector.extract_strided_slice %15 {offsets = [0, 16], sizes = [8, 8], strides = [1, 1]} : vector<8x32xf32> to vector<8x8xf32>
    %57 = vector.extract_strided_slice %20 {offsets = [0, 16], sizes = [8, 8], strides = [1, 1]} : vector<8x32xf32> to vector<8x8xf32>
    %58 = tpu.transpose %56, [1, 0] : vector<8x8xf32> -> vector<8x8xf32>
    %cst_31 = arith.constant dense<0.000000e+00> : vector<8x8xf32>
    %59 = tpu.matmul %55, %58, %cst_31 {dimension_numbers = #tpu.dot_dimension_numbers<[1], [0], [0], [1], [0, 0, 1, 1], [], []>} : vector<8x8xf32>, vector<8x8xf32>, vector<8x8xf32> -> vector<8x8xf32>
    %cst_32 = arith.constant dense<0xFF800000> : vector<8xf32>
    %60 = vector.multi_reduction <maximumf>, %59, %cst_32 [1] : vector<8x8xf32> to vector<8xf32>
    %61 = vector.shape_cast %60 : vector<8xf32> to vector<8x1xf32>
    %62 = vector.broadcast %61 : vector<8x1xf32> to vector<8x8xf32>
    %63 = arith.subf %59, %62 : vector<8x8xf32>
    %64 = math.exp %63 : vector<8x8xf32>
    %cst_33 = arith.constant dense<0.000000e+00> : vector<8xf32>
    %65 = vector.multi_reduction <add>, %64, %cst_33 [1] : vector<8x8xf32> to vector<8xf32>
    %66 = vector.shape_cast %65 : vector<8xf32> to vector<8x1xf32>
    %67 = tpu.reciprocal %66 : vector<8x1xf32> -> vector<8x1xf32>
    %68 = vector.broadcast %67 : vector<8x1xf32> to vector<8x8xf32>
    %69 = arith.mulf %64, %68 : vector<8x8xf32>
    %cst_34 = arith.constant dense<0.000000e+00> : vector<8x8xf32>
    %70 = tpu.matmul %69, %57, %cst_34 {dimension_numbers = #tpu.dot_dimension_numbers<[1], [0], [0], [1], [0, 0, 1, 1], [], []>} : vector<8x8xf32>, vector<8x8xf32>, vector<8x8xf32> -> vector<8x8xf32>
    %71 = vector.extract_strided_slice %22 {offsets = [0, 24], sizes = [8, 8], strides = [1, 1]} : vector<8x32xf32> to vector<8x8xf32>
    %72 = vector.extract_strided_slice %15 {offsets = [0, 24], sizes = [8, 8], strides = [1, 1]} : vector<8x32xf32> to vector<8x8xf32>
    %73 = vector.extract_strided_slice %20 {offsets = [0, 24], sizes = [8, 8], strides = [1, 1]} : vector<8x32xf32> to vector<8x8xf32>
    %74 = tpu.transpose %72, [1, 0] : vector<8x8xf32> -> vector<8x8xf32>
    %cst_35 = arith.constant dense<0.000000e+00> : vector<8x8xf32>
    %75 = tpu.matmul %71, %74, %cst_35 {dimension_numbers = #tpu.dot_dimension_numbers<[1], [0], [0], [1], [0, 0, 1, 1], [], []>} : vector<8x8xf32>, vector<8x8xf32>, vector<8x8xf32> -> vector<8x8xf32>
    %cst_36 = arith.constant dense<0xFF800000> : vector<8xf32>
    %76 = vector.multi_reduction <maximumf>, %75, %cst_36 [1] : vector<8x8xf32> to vector<8xf32>
    %77 = vector.shape_cast %76 : vector<8xf32> to vector<8x1xf32>
    %78 = vector.broadcast %77 : vector<8x1xf32> to vector<8x8xf32>
    %79 = arith.subf %75, %78 : vector<8x8xf32>
    %80 = math.exp %79 : vector<8x8xf32>
    %cst_37 = arith.constant dense<0.000000e+00> : vector<8xf32>
    %81 = vector.multi_reduction <add>, %80, %cst_37 [1] : vector<8x8xf32> to vector<8xf32>
    %82 = vector.shape_cast %81 : vector<8xf32> to vector<8x1xf32>
    %83 = tpu.reciprocal %82 : vector<8x1xf32> -> vector<8x1xf32>
    %84 = vector.broadcast %83 : vector<8x1xf32> to vector<8x8xf32>
    %85 = arith.mulf %80, %84 : vector<8x8xf32>
    %cst_38 = arith.constant dense<0.000000e+00> : vector<8x8xf32>
    %86 = tpu.matmul %85, %73, %cst_38 {dimension_numbers = #tpu.dot_dimension_numbers<[1], [0], [0], [1], [0, 0, 1, 1], [], []>} : vector<8x8xf32>, vector<8x8xf32>, vector<8x8xf32> -> vector<8x8xf32>
    %87 = tpu.concatenate %38, %54, %70, %86 in 1 : vector<8x8xf32>, vector<8x8xf32>, vector<8x8xf32>, vector<8x8xf32> -> vector<8x32xf32>
    %c0_39 = arith.constant 0 : index
    %c0_40 = arith.constant 0 : index
    %88 = vector.load %arg8[%c0_39, %c0_40] : memref<32x32xf32, #tpu.memory_space<vmem>>, vector<32x32xf32>
    %cst_41 = arith.constant dense<0.000000e+00> : vector<8x32xf32>
    %89 = tpu.matmul %87, %88, %cst_41 {dimension_numbers = #tpu.dot_dimension_numbers<[1], [0], [0], [1], [0, 0, 1, 1], [], []>} : vector<8x32xf32>, vector<32x32xf32>, vector<8x32xf32> -> vector<8x32xf32>
    %c0_42 = arith.constant 0 : index
    %c0_43 = arith.constant 0 : index
    %90 = vector.load %arg12[%c0_42, %c0_43] : memref<1x32xf32, #tpu.memory_space<vmem>>, vector<1x32xf32>
    %91 = vector.broadcast %90 : vector<1x32xf32> to vector<8x32xf32>
    %92 = arith.addf %89, %91 : vector<8x32xf32>
    %c0_44 = arith.constant 0 : index
    %c0_45 = arith.constant 0 : index
    %c0_46 = arith.constant 0 : index
    %93 = vector.load %arg4[%c0_44, %c0_45, %c0_46] : memref<1x8x32xf32, #tpu.memory_space<vmem>>, vector<1x8x32xf32>
    %94 = vector.shape_cast %93 : vector<1x8x32xf32> to vector<8x32xf32>
    %c0_47 = arith.constant 0 : index
    %c0_48 = arith.constant 0 : index
    %95 = vector.load %arg13[%c0_47, %c0_48] : memref<1x32xf32, #tpu.memory_space<vmem>>, vector<1x32xf32>
    %c0_49 = arith.constant 0 : index
    %c0_50 = arith.constant 0 : index
    %96 = vector.load %arg14[%c0_49, %c0_50] : memref<1x32xf32, #tpu.memory_space<vmem>>, vector<1x32xf32>
    %97 = arith.addf %92, %94 : vector<8x32xf32>
    %cst_51 = arith.constant dense<0.000000e+00> : vector<8xf32>
    %98 = vector.multi_reduction <add>, %97, %cst_51 [1] : vector<8x32xf32> to vector<8xf32>
    %99 = vector.shape_cast %98 : vector<8xf32> to vector<8x1xf32>
    %cst_52 = arith.constant 3.200000e+01 : f32
    %100 = vector.broadcast %cst_52 : f32 to vector<8x1xf32>
    %101 = arith.divf %99, %100 : vector<8x1xf32>
    %102 = vector.broadcast %101 : vector<8x1xf32> to vector<8x32xf32>
    %103 = arith.subf %97, %102 : vector<8x32xf32>
    %104 = arith.mulf %103, %103 : vector<8x32xf32>
    %cst_53 = arith.constant dense<0.000000e+00> : vector<8xf32>
    %105 = vector.multi_reduction <add>, %104, %cst_53 [1] : vector<8x32xf32> to vector<8xf32>
    %106 = vector.shape_cast %105 : vector<8xf32> to vector<8x1xf32>
    %cst_54 = arith.constant 3.200000e+01 : f32
    %107 = vector.broadcast %cst_54 : f32 to vector<8x1xf32>
    %108 = arith.divf %106, %107 : vector<8x1xf32>
    %cst_55 = arith.constant 9.99999974E-6 : f32
    %109 = vector.broadcast %cst_55 : f32 to vector<8x1xf32>
    %110 = arith.addf %108, %109 : vector<8x1xf32>
    %111 = math.rsqrt %110 : vector<8x1xf32>
    %112 = vector.broadcast %111 : vector<8x1xf32> to vector<8x32xf32>
    %113 = arith.mulf %103, %112 : vector<8x32xf32>
    %114 = vector.broadcast %95 : vector<1x32xf32> to vector<8x32xf32>
    %115 = arith.mulf %113, %114 : vector<8x32xf32>
    %116 = vector.broadcast %96 : vector<1x32xf32> to vector<8x32xf32>
    %117 = arith.addf %115, %116 : vector<8x32xf32>
    %c0_56 = arith.constant 0 : index
    %c0_57 = arith.constant 0 : index
    %c0_58 = arith.constant 0 : index
    %118 = vector.load %arg15[%c0_56, %c0_57, %c0_58] : memref<1x8x32xf32, #tpu.memory_space<vmem>>, vector<1x8x32xf32>
    %119 = vector.shape_cast %118 : vector<1x8x32xf32> to vector<8x32xf32>
    %120 = vector.shape_cast %117 : vector<8x32xf32> to vector<1x8x32xf32>
    tpu.vector_store %arg15[%c0_56, %c0_57, %c0_58], %120 {strides = array<i32>} : memref<1x8x32xf32, #tpu.memory_space<vmem>>, vector<1x8x32xf32>,
    return
  }
  func.func @transform_0(%arg0: i32) -> (i32, i32, i32) {
    %c0_i32 = arith.constant 0 : i32
    %c0_i32_0 = arith.constant 0 : i32
    %c0_i32_1 = arith.constant 0 : i32
    return %arg0, %c0_i32, %c0_i32_0 : i32, i32, i32
  }
  func.func @transform_1(%arg0: i32) -> (i32, i32, i32) {
    %c0_i32 = arith.constant 0 : i32
    %c0_i32_0 = arith.constant 0 : i32
    %c0_i32_1 = arith.constant 0 : i32
    return %arg0, %c0_i32, %c0_i32_0 : i32, i32, i32
  }
  func.func @transform_2(%arg0: i32) -> (i32, i32, i32) {
    %c0_i32 = arith.constant 0 : i32
    %c0_i32_0 = arith.constant 0 : i32
    %c0_i32_1 = arith.constant 0 : i32
    return %arg0, %c0_i32, %c0_i32_0 : i32, i32, i32
  }
  func.func @transform_3(%arg0: i32) -> (i32, i32, i32) {
    %c0_i32 = arith.constant 0 : i32
    %c0_i32_0 = arith.constant 0 : i32
    %c0_i32_1 = arith.constant 0 : i32
    return %arg0, %c0_i32, %c0_i32_0 : i32, i32, i32
  }
  func.func @transform_4(%arg0: i32) -> (i32, i32) {
    %c0_i32 = arith.constant 0 : i32
    %c0_i32_0 = arith.constant 0 : i32
    %c0_i32_1 = arith.constant 0 : i32
    return %c0_i32, %c0_i32_0 : i32, i32
  }
  func.func @transform_5(%arg0: i32) -> (i32, i32) {
    %c0_i32 = arith.constant 0 : i32
    %c0_i32_0 = arith.constant 0 : i32
    %c0_i32_1 = arith.constant 0 : i32
    return %c0_i32, %c0_i32_0 : i32, i32
  }
  func.func @transform_6(%arg0: i32) -> (i32, i32) {
    %c0_i32 = arith.constant 0 : i32
    %c0_i32_0 = arith.constant 0 : i32
    %c0_i32_1 = arith.constant 0 : i32
    return %c0_i32, %c0_i32_0 : i32, i32
  }
  func.func @transform_7(%arg0: i32) -> (i32, i32) {
    %c0_i32 = arith.constant 0 : i32
    %c0_i32_0 = arith.constant 0 : i32
    %c0_i32_1 = arith.constant 0 : i32
    return %c0_i32, %c0_i32_0 : i32, i32
  }
  func.func @transform_8(%arg0: i32) -> (i32, i32) {
    %c0_i32 = arith.constant 0 : i32
    %c0_i32_0 = arith.constant 0 : i32
    %c0_i32_1 = arith.constant 0 : i32
    return %c0_i32, %c0_i32_0 : i32, i32
  }
  func.func @transform_9(%arg0: i32) -> (i32, i32) {
    %c0_i32 = arith.constant 0 : i32
    %c0_i32_0 = arith.constant 0 : i32
    %c0_i32_1 = arith.constant 0 : i32
    return %c0_i32, %c0_i32_0 : i32, i32
  }
  func.func @transform_10(%arg0: i32) -> (i32, i32) {
    %c0_i32 = arith.constant 0 : i32
    %c0_i32_0 = arith.constant 0 : i32
    %c0_i32_1 = arith.constant 0 : i32
    return %c0_i32, %c0_i32_0 : i32, i32
  }
  func.func @transform_11(%arg0: i32) -> (i32, i32) {
    %c0_i32 = arith.constant 0 : i32
    %c0_i32_0 = arith.constant 0 : i32
    %c0_i32_1 = arith.constant 0 : i32
    return %c0_i32, %c0_i32_0 : i32, i32
  }
  func.func @transform_12(%arg0: i32) -> (i32, i32) {
    %c0_i32 = arith.constant 0 : i32
    %c0_i32_0 = arith.constant 0 : i32
    %c0_i32_1 = arith.constant 0 : i32
    return %c0_i32, %c0_i32_0 : i32, i32
  }
  func.func @transform_13(%arg0: i32) -> (i32, i32) {
    %c0_i32 = arith.constant 0 : i32
    %c0_i32_0 = arith.constant 0 : i32
    %c0_i32_1 = arith.constant 0 : i32
    return %c0_i32, %c0_i32_0 : i32, i32
  }
  func.func @transform_14(%arg0: i32) -> (i32, i32, i32) {
    %c0_i32 = arith.constant 0 : i32
    %c0_i32_0 = arith.constant 0 : i32
    %c0_i32_1 = arith.constant 0 : i32
    return %arg0, %c0_i32, %c0_i32_0 : i32, i32, i32
  }
}

</mosaic_0001>

<bundles_post_ra>
// kernel: tpu_custom_call.1
= control target key start
LH: loop header
LB: loop body
LE: loop exit
PB: predicated region body
PF: predicated region fallthrough
CT: control target
= control target key end

     0   :  { %s3015_s0 = inlined_call_operand.hbm [shape: f32[2,8,32], index: 0, kind: input, shape index: {}]   ;;  %s3016_s1 = inlined_call_operand.hbm [shape: f32[2,8,32], index: 1, kind: input, shape index: {}]   ;;  %s3017_s2 = inlined_call_operand.hbm [shape: f32[2,8,32], index: 2, kind: input, shape index: {}]   ;;  %s3018_s3 = inlined_call_operand.hbm [shape: f32[2,8,32], index: 3, kind: input, shape index: {}]   ;;  %s3019_s4 = inlined_call_operand.hbm [shape: f32[32,32], index: 4, kind: input, shape index: {}]   ;;  %s3020_s5 = inlined_call_operand.hbm [shape: f32[32,32], index: 5, kind: input, shape index: {}]   ;;  %s3021_s6 = inlined_call_operand.hbm [shape: f32[32,32], index: 6, kind: input, shape index: {}]   ;;  %s3022_s7 = inlined_call_operand.hbm [shape: f32[32,32], index: 7, kind: input, shape index: {}]   ;;  %s3023_s8 = inlined_call_operand.vmem [shape: f32[1,32], index: 8, kind: input, shape index: {}]   ;;  %s3024_s9 = inlined_call_operand.vmem [shape: f32[1,32], index: 9, kind: input, shape index: {}]   ;;  %s3025_s10 = inlined_call_operand.vmem [shape: f32[1,32], index: 10, kind: input, shape index: {}]   ;;  %s3026_s11 = inlined_call_operand.vmem [shape: f32[1,32], index: 11, kind: input, shape index: {}]   ;;  %s3027_s12 = inlined_call_operand.vmem [shape: f32[1,32], index: 12, kind: input, shape index: {}]   ;;  %s3028_s13 = inlined_call_operand.vmem [shape: f32[1,32], index: 13, kind: input, shape index: {}]   ;;  %s3029_s14 = inlined_call_operand.hbm [shape: f32[2,8,32], index: 14, kind: output, shape index: {}]  }
   0x1   :  { %3050 = sst [smem:[#allocation29_spill]] %s3015_s0 }
   0x2   :  { %3051 = sst [smem:[#allocation30_spill]] %s3016_s1 }
   0x3   :  { %3052 = sst [smem:[#allocation31_spill]] %s3019_s4 }
   0x4   :  { %3053 = sst [smem:[#allocation32_spill]] %s3020_s5 }
   0x5   :  { %3054 = sst [smem:[#allocation33_spill]] %s3024_s9 }
   0x6   :  { %3055 = sst [smem:[#allocation34_spill]] %s3025_s10 }
   0x7   :  { %3056 = sst [smem:[#allocation35_spill]] %s3026_s11 }
   0x8   :  { %3057 = sst [smem:[#allocation36_spill]] %s3027_s12 }
   0x9   :  { %3058 = sst [smem:[#allocation37_spill]] %s3028_s13 }
   0xa   :  { %3059 = sst [smem:[#allocation38_spill]] %s3029_s14 }
   0xb   :  { %19 = vsyncpa [#allocation3], 0 }
   0xc   :  { %21 = vsyncpa [#allocation3 + $0x1], 0 }
   0xd   :  { %22 = vsyncpa [#allocation6], 0 }
   0xe   :  { %24 = vsyncpa [#allocation6 + $0x1], 0 }
   0xf   :  { %25 = vsyncpa [#allocation9], 0 }
  0x10   :  { %27 = vsyncpa [#allocation9 + $0x1], 0 }
  0x11   :  { %28 = vsyncpa [#allocation12], 0 }
  0x12   :  { %29 = vsyncpa [#allocation15], 0 }
  0x13   :  { %30 = vsyncpa [#allocation4], 0 }
  0x14   :  { %32 = vsyncpa [#allocation4 + $0x1], 0  ;;  %s2582_s29 = smov 0   ;;  %s2584_s30 = smov 0  }
  0x15   :  { %s2586_s15 = smov 0   ;;  %s2588_s16 = smov 0  }
  0x16 LB: > { %3060 = sst [smem:[#allocation24_spill]] %s2474_s29  ;;  %s2603_s17 = sadd.s32 4294967295, %s2486_s16   ;;  %s2486_s16 = sphi %s2588_s16, %s3103_s16   ;;  %s2482_s15 = sphi %s2586_s15, %s3107_s15   ;;  %s2478_s30 = sphi %s2584_s30, %s3106_s30   ;;  %s2474_s29 = sphi %s2582_s29, %s3105_s29  }
  0x17   : > { %s1885_s18 = sadd.s32 4294967294, %s2486_s16   ;;  %p58_p0 = scmp.ne.s32.totalorder %s2478_s30, %s2474_s29 }
  0x18   : > { %p3042_p1 = scmp.eq.s32.totalorder %s2603_s17, 0  ;;  %p370_p2 = scmp.eq.s32.totalorder %s2603_s17, 1 }
  0x19   : > { %p376_p3 = scmp.eq.s32.totalorder %s1885_s18, 1  ;;  %p1886_p5 = scmp.ge.s32.totalorder %s2486_s16, 1 }
  0x1a   : > { %p2612_p4 = por %p3042_p1, %p58_p0  ;;  %p383_p7 = scmp.lt.s32.totalorder %s2486_s16, 3 }
  0x1b   : > { %p2617_p6 = por %p376_p3, %p58_p0  ;;  %s2488_s22 = smov [#allocation10]  }
  0x1c   : > { %s3061_s19 = scalar_select %p2612_p4, 1, 0 }
  0x1d   : > { %s3062_s20 = scalar_select %p2617_p6, 1, 0 }
  0x1e   : > { %p2622_p8 = pnand %p1886_p5, %p383_p7  ;;  %s395_s23 = sshll.u32 %s2488_s22, 4  ;;  %s396_s23 = int_to_ptr.vmem [resolvable:$true] %s395_s23 }
  0x1f   : > { %3063 = sst [smem:[#allocation25_spill]] %s3062_s20  ;;  %s2489_s25 = smov [#allocation11]  }
  0x20   : > { %s3064_s21 = scalar_select %p2622_p8, 1, 0 }
  0x21   : > { %p2082_p9 = pneg %p2622_p8  ;;  %s408_s26 = sshll.u32 %s2489_s25, 4  ;;  %s409_s26 = int_to_ptr.vmem [resolvable:$true] %s408_s26 }
  0x22   : > { %s2197_s27 = scalar_lea.vmem %s396_s23, 512  ;;  %p2205_p5 = scmp.lt.s32.totalorder %s396_s23, %s396_s23 }
  0x23   : > { %p2631_p11 = pnand %p2082_p9, %p3042_p1  ;;  %p2198_p13 = scmp.ne.s32.totalorder %s396_s23, %s2197_s27 }
  0x24   : > { %p2206_p7 = scmp.lt.s32.totalorder %s2197_s27, %s2197_s27 }
  0x25   : > { %s3065_s24 = scalar_select %p2631_p11, 1, 0 }
  0x26   : > { %p3043_p12 = pneg %p2631_p11  ;;  %p2207_p10 = por %p2206_p7, %p2205_p5 }
  0x28   : > { %p2200_p0 = pnand %p2198_p13, %p3043_p12 }
  0x2a   : > { %p2201_p3 = pneg %p2200_p0 }
  0x2c   : > { %p2208_p9 = pnand %p2207_p10, %p2201_p3 }
  0x2e   : > { %2211 = shalt.err (!%p2208_p9)
}
  0x2f   : > { %s3032_s28 = smov 128   ;;  %s3034_s18 = smov 8  }
  0x30   : > { %s3066_s4 = sld [smem:[#allocation31_spill]]  ;;  %s2223_s20 = scalar_lea.vmem %s409_s26, 512 }
  0x31   : > { %p2224_p13 = scmp.ne.s32.totalorder %s409_s26, %s2223_s20  ;;  %p2231_p10 = scmp.lt.s32.totalorder %s409_s26, %s409_s26 }
  0x32   : > { %p2232_p3 = scmp.lt.s32.totalorder %s2223_s20, %s2223_s20 }
  0x33   : > { %p2226_p0 = pnand %p2224_p13, %p3043_p12 }
  0x34   : > { %p2233_p7 = por %p2232_p3, %p2231_p10 }
  0x35   : > { %p2227_p5 = pneg %p2226_p0 }
  0x36   : > { %2085 = dma.hbm_to_vmem [thread:$0]  (!%p2631_p11), %s3066_s4, 512, %s396_s23, [#allocation9], %s3032_s28, %s3032_s28, %s3034_s18  }
  0x37   : > { %p2234_p9 = pnand %p2233_p7, %p2227_p5 }
  0x39   : > { %2237 = shalt.err (!%p2234_p9)
}
  0x3a   : > { %s3067_s5 = sld [smem:[#allocation32_spill]]  ;;  %s2660_s20 = sadd.s32 1, %s2486_s16  }
  0x3b   : > { %3068 = sst [smem:[#allocation26_spill]] %s2660_s20  ;;  %s45_s23 = sadd.s32 1, %s2482_s15 }
  0x3c   : > { %s42_s22 = ssub.s32 %s2486_s16, %s2660_s20  ;;  %p52_p13 = scmp.ne.s32.totalorder %s2482_s15, %s2478_s30 }
  0x3d   : > { %p43_p0 = scmp.eq.s32.totalorder %s42_s22, 0  ;;  %p53_p5 = scmp.eq.s32.totalorder %s2486_s16, 0 }
  0x3e   : > { %p2670_p10 = por %p370_p2, %p52_p13  ;;  %p2116_p3 = scmp.lt.s32.totalorder %s2486_s16, 2 }
  0x3f   : > { %s2676_s25 = scalar_select %p43_p0, %s2482_s15, %s45_s23  }
  0x40   : > { %2088 = dma.hbm_to_vmem [thread:$0]  (!%p2631_p11), %s3067_s5, 512, %s409_s26, [#allocation12], %s3032_s28, %s3032_s28, %s3034_s18  }
  0x41   : > { %s3069_s29 = scalar_select %p2670_p10, 1, 0 }
  0x42   : > { %3071 = sst [smem:[#allocation28_spill]] %s2676_s25  ;;  %p54_p7 = por %p53_p5, %p52_p13 }
  0x43   : > { %3070 = sst [smem:[#allocation27_spill]] %s3069_s29  ;;  %s3036_s27 = sand.u32 1, %s2482_s15  }
  0x44   : > { %s2681_s26 = sshll.u32 %s3036_s27, 3  ;;  %s2684_s28 = sshll.u32 %s2486_s16, 7 }
  0x45   : > { %p2686_p9 = pnand %p2116_p3, %p54_p7  ;;  %s3044_s18 = sand.u32 1, %s2486_s16  }
  0x46   : > { %s3073_s1 = sld [smem:[#allocation30_spill]]  ;;  %s488_s27 = scalar_lea.vmem [#allocation5], %s2681_s26 }
  0x47   : > { %s495_s25 = sshll.u32 %s488_s27, 4  ;;  %s2700_s20 = scalar_lea.sflag [#allocation6], %s3044_s18  ;;  %s496_s25 = int_to_ptr.vmem [resolvable:$true] %s495_s25 }
  0x48   : > { %p2706_p13 = pneg %p2686_p9 }
  0x4c   : > { %s2695_s23 = scalar_lea.hbm %s3073_s1, %s2684_s28  ;;  %s2243_s12 = scalar_lea.hbm %s3073_s1, 256 }
  0x4d   : > { %s2238_s14 = scalar_lea.hbm %s2695_s23, 128  ;;  %p2244_p3 = scmp.lt.s32.totalorder %s2695_s23, %s3073_s1 }
  0x4e   : > { %p2239_p2 = scmp.ne.s32.totalorder %s2695_s23, %s2238_s14  ;;  %p2245_p7 = scmp.lt.s32.totalorder %s2243_s12, %s2238_s14 }
  0x50   : > { %p2241_p0 = pnand %p2706_p13, %p2239_p2  ;;  %p2246_p1 = por %p2245_p7, %p2244_p3 }
  0x52   : > { %p2242_p5 = pneg %p2241_p0 }
  0x54   : > { %p2247_p12 = pnand %p2246_p1, %p2242_p5 }
  0x56   : > { %2250 = shalt.err (!%p2247_p12)
}
  0x57   : > { %s2251_s18 = scalar_lea.vmem %s496_s25, 128  ;;  %s2492_s11 = smov [#allocation5]  }
  0x58   : > { %p2252_p6 = scmp.ne.s32.totalorder %s496_s25, %s2251_s18  ;;  %s2256_s10 = sshll.u32 %s2492_s11, 4  ;;  %s2257_s10 = int_to_ptr.vmem [resolvable:$false] %s2256_s10 }
  0x59   : > { %s2258_s9 = scalar_lea.vmem %s2257_s10, 256  ;;  %p2259_p2 = scmp.lt.s32.totalorder %s496_s25, %s2257_s10 }
  0x5a   : > { %p2254_p10 = pnand %p2252_p6, %p2706_p13  ;;  %p2260_p0 = scmp.lt.s32.totalorder %s2258_s9, %s2251_s18 }
  0x5c   : > { %p2255_p4 = pneg %p2254_p10  ;;  %p2261_p8 = por %p2260_p0, %p2259_p2 }
  0x5e   : > { %p2262_p11 = pnand %p2261_p8, %p2255_p4 }
  0x60   : > { %2265 = shalt.err (!%p2262_p11)
}
  0x61   : > { %2101 = dma.hbm_to_vmem [thread:$0]  (!%p2686_p9), %s2695_s23, 128, %s496_s25, %s2700_s20  }
  0x62   : > { %s2493_s12 = smov [#allocation13]   ;;  %s2494_s29 = smov [#allocation14]  }
  0x63   : > { %s421_s14 = sshll.u32 %s2493_s12, 4  ;;  %s434_s4 = sshll.u32 %s2494_s29, 4  ;;  %s422_s14 = int_to_ptr.vmem [resolvable:$true] %s421_s14  ;;  %s435_s4 = int_to_ptr.vmem [resolvable:$true] %s434_s4 }
  0x64   : > { %s2277_s5 = scalar_lea.vmem %s422_s14, 512  ;;  %p3075_p6 = scmp.ne.s32.totalorder %s3065_s24, 0 }
  0x65   : > { %p2278_p1 = scmp.ne.s32.totalorder %s422_s14, %s2277_s5  ;;  %p2285_p3 = scmp.lt.s32.totalorder %s422_s14, %s422_s14 }
  0x66   : > { %p3076_p12 = pneg %p3075_p6  ;;  %p2286_p4 = scmp.lt.s32.totalorder %s2277_s5, %s2277_s5 }
  0x68   : > { %p2280_p10 = pnand %p2278_p1, %p3076_p12  ;;  %p2287_p8 = por %p2286_p4, %p2285_p3 }
  0x6a   : > { %p2281_p5 = pneg %p2280_p10 }
  0x6c   : > { %p2288_p11 = pnand %p2287_p8, %p2281_p5 }
  0x6e   : > { %2291 = shalt.err (!%p2288_p11)
}
  0x6f   : > { %s3077_s9 = smov 8   ;;  %s3078_s10 = smov 128  }
  0x70   : > { %2091 = dma.hbm_to_vmem [thread:$0]  (!%p3075_p6), %s3021_s6, 512, %s422_s14, [#allocation12], %s3078_s10, %s3078_s10, %s3077_s9  }
  0x71   : > { %s2303_s25 = scalar_lea.vmem %s435_s4, 512  ;;  %p3079_p2 = pmov %p3076_p12 }
  0x72   : > { %p2304_p7 = scmp.ne.s32.totalorder %s435_s4, %s2303_s25  ;;  %p2311_p12 = scmp.lt.s32.totalorder %s435_s4, %s435_s4 }
  0x73   : > { %p2312_p10 = scmp.lt.s32.totalorder %s2303_s25, %s2303_s25 }
  0x74   : > { %p2306_p0 = pnand %p2304_p7, %p3079_p2 }
  0x75   : > { %p2313_p5 = por %p2312_p10, %p2311_p12 }
  0x76   : > { %p2307_p1 = pneg %p2306_p0 }
  0x78   : > { %p2314_p3 = pnand %p2313_p5, %p2307_p1 }
  0x7a   : > { %2317 = shalt.err (!%p2314_p3)
}
  0x7b   : > { %2094 = dma.hbm_to_vmem [thread:$0]  (!%p3075_p6), %s3022_s7, 512, %s435_s4, [#allocation15], %s3078_s10, %s3078_s10, %s3077_s9  }
  0x7c   : > { %s3080_s0 = sld [smem:[#allocation29_spill]]  ;;  %s470_s24 = scalar_lea.vmem [#allocation2], %s2681_s26 }
  0x7d   : > { %s477_s5 = sshll.u32 %s470_s24, 4  ;;  %s2758_s25 = scalar_lea.hbm %s3017_s2, %s2684_s28  ;;  %s478_s5 = int_to_ptr.vmem [resolvable:$true] %s477_s5 }
  0x7e   : > { %s3081_s23 = sand.u32 1, %s2482_s15  }
  0x7f   : > { %s467_s27 = scalar_lea.sflag [#allocation3], %s3081_s23 }
  0x82   : > { %s2751_s29 = scalar_lea.hbm %s3080_s0, %s2684_s28  ;;  %s2323_s10 = scalar_lea.hbm %s3080_s0, 256 }
  0x83   : > { %s2318_s1 = scalar_lea.hbm %s2751_s29, 128  ;;  %p2324_p11 = scmp.lt.s32.totalorder %s2751_s29, %s3080_s0 }
  0x84   : > { %p2319_p6 = scmp.ne.s32.totalorder %s2751_s29, %s2318_s1  ;;  %p2325_p7 = scmp.lt.s32.totalorder %s2323_s10, %s2318_s1 }
  0x86   : > { %p2321_p4 = pnand %p2319_p6, %p2706_p13  ;;  %p2326_p2 = por %p2325_p7, %p2324_p11 }
  0x88   : > { %p2322_p8 = pneg %p2321_p4 }
  0x8a   : > { %p2327_p0 = pnand %p2326_p2, %p2322_p8 }
  0x8c   : > { %2330 = shalt.err (!%p2327_p0)
}
  0x8d   : > { %s2331_s24 = scalar_lea.vmem %s478_s5, 128  ;;  %s2495_s11 = smov [#allocation2]  }
  0x8e   : > { %p2332_p1 = scmp.ne.s32.totalorder %s478_s5, %s2331_s24  ;;  %s2336_s18 = sshll.u32 %s2495_s11, 4  ;;  %s2337_s18 = int_to_ptr.vmem [resolvable:$false] %s2336_s18 }
  0x8f   : > { %s2338_s23 = scalar_lea.vmem %s2337_s18, 256  ;;  %p2339_p5 = scmp.lt.s32.totalorder %s478_s5, %s2337_s18 }
  0x90   : > { %p2334_p12 = pnand %p2332_p1, %p2706_p13  ;;  %p2340_p3 = scmp.lt.s32.totalorder %s2338_s23, %s2331_s24 }
  0x92   : > { %p2335_p10 = pneg %p2334_p12  ;;  %p2341_p6 = por %p2340_p3, %p2339_p5 }
  0x94   : > { %p2342_p4 = pnand %p2341_p6, %p2335_p10 }
  0x96   : > { %2345 = shalt.err (!%p2342_p4)
}
  0x97   : > { %2098 = dma.hbm_to_vmem [thread:$0]  (!%p2686_p9), %s2751_s29, 128, %s478_s5, %s467_s27  }
  0x98   : > { %s506_s1 = scalar_lea.vmem [#allocation7], %s2681_s26  ;;  %s2783_s12 = scalar_lea.hbm %s3018_s3, %s2684_s28 }
  0x99   : > { %s513_s4 = sshll.u32 %s506_s1, 4  ;;  %s2346_s14 = scalar_lea.hbm %s2758_s25, 128  ;;  %s514_s4 = int_to_ptr.vmem [resolvable:$true] %s513_s4 }
  0x9a   : > { %p2347_p8 = scmp.ne.s32.totalorder %s2758_s25, %s2346_s14  ;;  %s2351_s18 = scalar_lea.hbm %s3017_s2, 256 }
  0x9b   : > { %p2352_p2 = scmp.lt.s32.totalorder %s2758_s25, %s3017_s2  ;;  %p2353_p0 = scmp.lt.s32.totalorder %s2351_s18, %s2346_s14 }
  0x9c   : > { %p2349_p11 = pnand %p2347_p8, %p2706_p13 }
  0x9d   : > { %p2354_p1 = por %p2353_p0, %p2352_p2 }
  0x9e   : > { %p2350_p7 = pneg %p2349_p11 }
  0xa0   : > { %p2355_p12 = pnand %p2354_p1, %p2350_p7 }
  0xa2   : > { %2358 = shalt.err (!%p2355_p12)
}
  0xa3   : > { %s2359_s29 = scalar_lea.vmem %s514_s4, 128  ;;  %s2496_s28 = smov [#allocation7]  }
  0xa4   : > { %p2360_p10 = scmp.ne.s32.totalorder %s514_s4, %s2359_s29  ;;  %s2364_s5 = sshll.u32 %s2496_s28, 4  ;;  %s2365_s5 = int_to_ptr.vmem [resolvable:$false] %s2364_s5 }
  0xa5   : > { %s2366_s27 = scalar_lea.vmem %s2365_s5, 256  ;;  %p2367_p6 = scmp.lt.s32.totalorder %s514_s4, %s2365_s5 }
  0xa6   : > { %p2362_p5 = pnand %p2360_p10, %p2706_p13  ;;  %p2368_p4 = scmp.lt.s32.totalorder %s2366_s27, %s2359_s29 }
  0xa8   : > { %p2363_p3 = pneg %p2362_p5  ;;  %p2369_p8 = por %p2368_p4, %p2367_p6 }
  0xaa   : > { %p2370_p11 = pnand %p2369_p8, %p2363_p3 }
  0xac   : > { %2373 = shalt.err (!%p2370_p11)
}
  0xad   : > { %2104 = dma.hbm_to_vmem [thread:$0]  (!%p2686_p9), %s2758_s25, 128, %s514_s4, %s2700_s20  }
  0xae   : > { %s524_s0 = scalar_lea.vmem [#allocation8], %s2681_s26  ;;  %s3082_s9 = sand.u32 1, %s2486_s16  }
  0xaf   : > { %s531_s1 = sshll.u32 %s524_s0, 4  ;;  %s521_s10 = scalar_lea.sflag [#allocation9], %s3082_s9  ;;  %s532_s1 = int_to_ptr.vmem [resolvable:$true] %s531_s1 }
  0xb0   : > { %s2374_s14 = scalar_lea.hbm %s2783_s12, 128  ;;  %s2379_s18 = scalar_lea.hbm %s3018_s3, 256 }
  0xb1   : > { %p2375_p7 = scmp.ne.s32.totalorder %s2783_s12, %s2374_s14  ;;  %p2380_p1 = scmp.lt.s32.totalorder %s2783_s12, %s3018_s3 }
  0xb2   : > { %p2381_p12 = scmp.lt.s32.totalorder %s2379_s18, %s2374_s14 }
  0xb3   : > { %p2377_p2 = pnand %p2375_p7, %p2706_p13 }
  0xb4   : > { %p2382_p10 = por %p2381_p12, %p2380_p1 }
  0xb5   : > { %p2378_p0 = pneg %p2377_p2 }
  0xb7   : > { %p2383_p5 = pnand %p2382_p10, %p2378_p0 }
  0xb9   : > { %2386 = shalt.err (!%p2383_p5)
}
  0xba   : > { %s2387_s20 = scalar_lea.vmem %s532_s1, 128  ;;  %s2497_s26 = smov [#allocation8]  }
  0xbb   : > { %p2388_p3 = scmp.ne.s32.totalorder %s532_s1, %s2387_s20  ;;  %s2392_s25 = sshll.u32 %s2497_s26, 4  ;;  %s2393_s25 = int_to_ptr.vmem [resolvable:$false] %s2392_s25 }
  0xbc   : > { %s2394_s4 = scalar_lea.vmem %s2393_s25, 256  ;;  %p2395_p8 = scmp.lt.s32.totalorder %s532_s1, %s2393_s25 }
  0xbd   : > { %p2390_p6 = pnand %p2388_p3, %p2706_p13  ;;  %p2396_p11 = scmp.lt.s32.totalorder %s2394_s4, %s2387_s20 }
  0xbf   : > { %p2391_p4 = pneg %p2390_p6  ;;  %p2397_p7 = por %p2396_p11, %p2395_p8 }
  0xc1   : > { %p2398_p2 = pnand %p2397_p7, %p2391_p4 }
  0xc3   : > { %2401 = shalt.err (!%p2398_p2)
}
  0xc4   : > { %2107 = dma.hbm_to_vmem [thread:$0]  (!%p2686_p9), %s2783_s12, 128, %s532_s1, %s521_s10  }
  0xc5   : > { %p3083_p0 = scmp.ne.s32.totalorder %s3064_s21, 0 }
  0xc6   : > { %s2824_s13 = sand.u32 (!%p3083_p0), 1, %s2478_s30   ;;  %p3084_p13 = scmp.ne.s32.totalorder (!%p3083_p0), %s3061_s19, 0 }
  0xc7   : > { %540 = sbr.rel (%p3083_p0) target bundleno = 2335 (0x91f), region = 76  ;;  %s2827_s28 = sshll.u32 (!%p3083_p0), %s2824_s13, 3 }
  0xc8   : > { %s543_s5 = scalar_lea.sflag (!%p3083_p0), [#allocation3], %s2824_s13  ;;  %s546_s27 = scalar_lea.vmem (!%p3083_p0), [#allocation2], %s2827_s28 }
  0xcc   : > { %2445 = dma.done.wait (%p3084_p13), %s543_s5, 128  }
  0xcd   : > { %2447 = vsyncadd (%p3084_p13), %s543_s5, 4294967168  ;;  %s551_s21 = sand.u32 1, %s2603_s17   ;;  %s555_s12 = scalar_lea.vmem [#allocation5], %s2827_s28 }
  0xce   : > { %s552_s22 = scalar_lea.sflag [#allocation6], %s551_s21 }
  0xcf   : > { %2449 = dma.done.wait (%p3084_p13), %s552_s22, 256  }
  0xd0   : > { %2451 = vsyncadd (%p3084_p13), %s552_s22, 4294967040  ;;  %s564_s0 = scalar_lea.vmem [#allocation7], %s2827_s28  ;;  %s570_s1 = scalar_lea.sflag [#allocation9], %s551_s21 }
  0xd1   : > { %s573_s9 = scalar_lea.vmem [#allocation8], %s2827_s28 }
  0xd2   : > { %2453 = dma.done.wait (%p3084_p13), %s570_s1, 128  }
  0xd3   : > { %2455 = vsyncadd (%p3084_p13), %s570_s1, 4294967168  ;;  %p3085_p9 = scmp.eq.s32.totalorder %s2603_s17, 0 }
  0xd5   : > { %2457 = dma.done.wait (%p3085_p9), [#allocation9], 512   ;;  %p3086_p1 = pmov %p3085_p9 }
  0xd7   : > { %2459 = vsyncadd (%p3086_p1), [#allocation9], 4294966784  ;;  %p3087_p12 = pmov %p3086_p1 }
  0xd8   : > { %p3088_p10 = pmov %p3086_p1 }
  0xd9   : > { %2461 = dma.done.wait (%p3087_p12), [#allocation12], 1024  }
  0xda   : > { %2463 = vsyncadd (%p3088_p10), [#allocation12], 4294966272  ;;  %p3089_p5 = pmov %p3086_p1 }
  0xdb   : > { %p3090_p3 = pmov %p3086_p1 }
  0xdc   : > { %2465 = dma.done.wait (%p3089_p5), [#allocation15], 512  }
  0xdd   : > { %2467 = vsyncadd (%p3090_p3), [#allocation15], 4294966784  ;;  %v2498_v0 = vmov 0.0   ;;  %vm2499_vm0 = vmmov 0   ;;  %v655_v1 = vld [vmem:[#allocation10 + $0x18] sm:$0xff]  ;;  %v654_v3 = vld [vmem:[#allocation10 + $0x10] sm:$0xff] }
  0xde   : > { %1972 = vmatprep.subr.mxu0 %v2498_v0  ;;  %1983 = vmatprep.subr.mxu1 %v2498_v0  ;;  %v740_v2 = vld [vmem:[#allocation11 + $0x18] sm:$0xff]  ;;  %v739_v4 = vld [vmem:[#allocation11 + $0x10] sm:$0xff]  ;;  %v653_v5 = vld [vmem:[#allocation10 + $0x8] sm:$0xff]  ;;  %vm663_vm1 = vcmask 261120   ;;  %s3091_s11 = sld [smem:[#allocation33_spill]]  ;;  %vm906_vm2 = vcmask 64512  }
  0xdf   : > { %1980 = vmatprep.mubr.msk.f32.mxu0 %vm2499_vm0, %v2498_v0  ;;  %1991 = vmatprep.mubr.msk.f32.mxu1 %vm2499_vm0, %v2498_v0  ;;  %v738_v6 = vld [vmem:[#allocation11 + $0x8] sm:$0xff]  ;;  %v652_v7 = vld [vmem:[#allocation10] sm:$0xff]  ;;  %v650_v10 = vld [vmem:[%s555_s12] sm:$0xff]  ;;  %s2500_s18 = smov 120   ;;  %s2501_s23 = smov 112   ;;  %vm1576_vm3 = vcmask 130048  }
  0xe0   : > { %1973 = vmatpush3.msra.mxu0 %v655_v1  ;;  %1984 = vmatpush3.msra.mxu1 %v740_v2  ;;  %v737_v8 = vld [vmem:[#allocation11] sm:$0xff]  ;;  %s2502_s29 = smov 104   ;;  %v824_v20 = vld [vmem:[#allocation13 + $0x18] sm:$0xff]  ;;  %v823_v21 = vld [vmem:[#allocation13 + $0x10] sm:$0xff]  ;;  %s3092_s25 = sld [smem:[#allocation34_spill]]  ;;  %vm1578_vm4 = vcmask 195584  }
  0xe1   : > { %1974 = vmatprep.subr.mxu0 %v2498_v0  ;;  %1985 = vmatprep.subr.mxu1 %v2498_v0  ;;  %v649_v9 = vld [vmem:[%s546_s27] sm:$0xff]  ;;  %s2503_s4 = smov 8   ;;  %s2504_s5 = smov 16  }
  0xe2   : > { %1975 = vmatpush3.msra.mxu0 %v654_v3  ;;  %1986 = vmatpush3.msra.mxu1 %v739_v4  ;;  %v1910_v11 = vld [vmem:[%s3023_s8] ss:$0 sm:$0xff]  ;;  %v822_v22 = vld [vmem:[#allocation13 + $0x8] sm:$0xff]  ;;  %s2505_s27 = smov 24   ;;  %s3093_s12 = sld [smem:[#allocation35_spill]] }
  0xe3   : > { %1976 = vmatprep.subr.mxu0 %v2498_v0  ;;  %1987 = vmatprep.subr.mxu1 %v2498_v0  ;;  %v821_v23 = vld [vmem:[#allocation13] sm:$0xff]  ;;  %s3095_s19 = sld [smem:[#allocation36_spill]] }
  0xe4   : > { %1977 = vmatpush3.msra.mxu0 %v653_v5  ;;  %1988 = vmatpush3.msra.mxu1 %v738_v6  ;;  %v1912_v12 = vld [vmem:[%s3091_s11] ss:$0 sm:$0xff]  ;;  %s3096_s24 = sld [smem:[#allocation37_spill]]  ;;  %s1933_s11 = sshll.u32 %s2603_s17, 7 }
  0xe5   : > { %1978 = vmatprep.subr.mxu0 %v2498_v0  ;;  %1989 = vmatprep.subr.mxu1 %v2498_v0  ;;  %v651_v24 = vld [vmem:[%s564_s0] sm:$0xff]  ;;  %s3094_s0 = sld [smem:[#allocation27_spill]] }
  0xe6   : > { %1979 = vmatpush3.msra.mxu0 %v652_v7  ;;  %1990 = vmatpush3.msra.mxu1 %v737_v8  ;;  %v1914_v33 = vld [vmem:[%s3092_s25] ss:$0 sm:$0xff]  ;;  %s3097_s26 = sld [smem:[#allocation38_spill]] }
  0xe7   : > { %1981 = vmatmul.mubr.msk.f32.vlgmr.msra.gmra.mxu0 %vm663_vm1, %v649_v9  ;;  %1992 = vmatmul.mubr.msk.f32.vlgmr.msra.gmra.mxu1 %vm663_vm1, %v650_v10 }
  0xe8   : > { %2005 = vmatprep.subr.mxu1 %v2498_v0  ;;  %2007 = vmatprep.mubr.msk.f32.mxu1 %vm2499_vm0, %v2498_v0 }
  0xe9   : > { %1994 = vmatprep.subr.mxu0 %v2498_v0  ;;  %2002 = vmatprep.mubr.msk.f32.mxu0 %vm2499_vm0, %v2498_v0 }
  0xea   : > { %1995 = vmatpush3.msra.mxu0 %v824_v20 }
  0xeb   : > { %1996 = vmatprep.subr.mxu0 %v2498_v0  ;;  %p3098_p4 = scmp.ne.s32.totalorder %s3094_s0, 0 }
  0xec   : > { %1997 = vmatpush3.msra.mxu0 %v823_v21  ;;  %v1583_v21 = vld [vmem:[#allocation14 + $0x18] sm:$0xff]  ;;  %s1709_s25 = scalar_lea.hbm %s3097_s26, %s1933_s11 }
  0xed   : > { %1998 = vmatprep.subr.mxu0 %v2498_v0 }
  0xee   : > { %1999 = vmatpush3.msra.mxu0 %v822_v22  ;;  %v1582_v22 = vld [vmem:[#allocation14 + $0x10] sm:$0xff] }
  0xef   : > { %2000 = vmatprep.subr.mxu0 %v2498_v0 }
  0xf0   : > { %2001 = vmatpush3.msra.mxu0 %v821_v23  ;;  %v1581_v23 = vld [vmem:[#allocation14 + $0x8] sm:$0xff] }
  0xf1   : > { %2003 = vmatmul.mubr.msk.f32.vlgmr.msra.gmra.mxu0 %vm663_vm1, %v651_v24  ;;  %2025 = vmatprep.subr.mxu0 %v2498_v0  ;;  %v1580_v24 = vld [vmem:[#allocation14] sm:$0xff] }
  0xf2   : > { %2027 = vmatprep.mubr.msk.f32.mxu0 %vm2499_vm0, %v2498_v0 }
 0x1a7   : > { %v733_v13 = vpop.f32.mrf.mxu0  ;;  %v817_v14 = vpop.f32.mrf.mxu1 }
 0x1a8   : > { %v734_v15 = vadd.f32 %v1910_v11, %v733_v13  ;;  %v818_v16 = vadd.f32 %v1912_v12, %v817_v14 }
 0x1a9   : > { %v1982_v17 = vpop.f32.mrf.mxu0  ;;  %v1993_v18 = vpop.f32.mrf.mxu1 }
 0x1aa   : > { %v905_v19 = vmul.f32 0.35355338, %v734_v15  ;;  %1069 = vrot.lane.b32.xlu1 %v818_v16, %s2500_s18  ;;  %2006 = vmatpush3.xpose.msk.msra.mxu1 %vm906_vm2, %v818_v16 }
 0x1ab   : > { %2010 = vmatprep.subr.mxu1 %v2498_v0 }
 0x1ad   : > { %2008 = vmatmul.mubr.msk.f32.vlgmr.msra.gmra.mxu1 %vm906_vm2, %v905_v19 }
 0x1ae   : > { %1067 = vrot.lane.b32.xlu1 %v905_v19, %s2500_s18  ;;  %2012 = vmatprep.mubr.msk.f32.mxu1 %vm2499_vm0, %v2498_v0 }
 0x1b1   : > { %v901_v34 = vpop.f32.mrf.mxu0 }
 0x1b2   : > { %1233 = vrot.lane.b32.xlu1 %v905_v19, %s2501_s23  ;;  %v2913_v35 = vadd.f32 %v1914_v33, %v901_v34 }
 0x1b3   : > { %v2004_v36 = vpop.f32.mrf.mxu0 }
 0x1b4   : > { %2011 = vmatpush3.msra.mxu1 %v2913_v35  ;;  %v1928_v36 = vld [vmem:[%s3093_s12] ss:$0 sm:$0xff] }
 0x1b5   : > { %2015 = vmatprep.subr.mxu1 %v2498_v0 }
 0x1b6   : > { %1400 = vrot.lane.b32.xlu1 %v818_v16, %s2502_s29 }
 0x1ba   : > { %1398 = vrot.lane.b32.xlu1 %v905_v19, %s2502_s29 }
 0x21c   : > { %v1070_v37 = vpop.permute.xlu1 %1069 }
 0x220   : > { %v1068_v38 = vpop.permute.xlu1 %1067 }
 0x224   : > { %v1234_v39 = vpop.permute.xlu1 %1233 }
 0x228   : > { %v1401_v42 = vpop.permute.xlu1 %1400 }
 0x22c   : > { %v1399_v43 = vpop.permute.xlu1 %1398 }
 0x26d   : > { %v979_v25 = vpop.f32.mrf.mxu1 }
 0x26e   : > { %v983_v26 = vsel %vm906_vm2, %v979_v25, -inf }
 0x26f   : > { %984 = vmax.xlane.f32.xlu0 %v983_v26  ;;  %v2009_v27 = vpop.f32.mrf.mxu1 }
 0x2f8   : > { %v985_v28 = vpop.xlane.xlu0 %984 }
 0x2f9   : > { %v986_v29 = vsub.f32 %v979_v25, %v985_v28 }
 0x2fb   : > { %v987_v30 = vmul.f32 1.442695, %v986_v29 }
 0x2fd   : > { %2168 = vpow2.f32 %v987_v30 }
 0x30a   : > { %v2169_v31 = vpop.eup %2168 }
 0x30b   : > { %v989_v32 = vsel %vm906_vm2, %v2169_v31, 0.0 }
 0x30c   : > { %990 = vadd.xlane.f32.xlu0 %v989_v32 }
 0x322   : > { %1235 = vrot.lane.b32.xlu0 %v818_v16, %s2501_s23 }
 0x395   : > { %v991_v40 = vpop.xlane.xlu0 %990 }
 0x396   : > { %2170 = vrcp.f32 %v991_v40 }
 0x399   : > { %v1236_v41 = vpop.permute.xlu0 %1235 }
 0x39a   : > { %2026 = vmatpush3.xpose.msk.msra.mxu0 %vm906_vm2, %v1236_v41 }
 0x39b   : > { %2035 = vmatprep.subr.mxu0 %v2498_v0 }
 0x39d   : > { %2028 = vmatmul.mubr.msk.f32.vlgmr.msra.gmra.mxu0 %vm906_vm2, %v1234_v39 }
 0x39e   : > { %2036 = vmatpush3.xpose.msk.msra.mxu0 %vm906_vm2, %v1401_v42  ;;  %2037 = vmatprep.mubr.msk.f32.mxu0 %vm2499_vm0, %v2498_v0 }
 0x39f   : > { %2045 = vmatprep.subr.mxu0 %v2498_v0 }
 0x3a1   : > { %2038 = vmatmul.mubr.msk.f32.vlgmr.msra.gmra.mxu0 %vm906_vm2, %v1399_v43 }
 0x3a2   : > { %2053 = vmatprep.mubr.msk.f32.mxu0 %vm2499_vm0, %v2498_v0  ;;  %2046 = vmatpush3.msra.mxu0 %v1583_v21 }
 0x3a3   : > { %v2171_v44 = vpop.eup %2170  ;;  %2047 = vmatprep.subr.mxu0 %v2498_v0 }
 0x3a4   : > { %v993_v45 = vmul.f32 %v2171_v44, %v2169_v31  ;;  %2048 = vmatpush3.msra.mxu0 %v1582_v22 }
 0x3a5   : > { %2049 = vmatprep.subr.mxu0 %v2498_v0 }
 0x3a6   : > { %2013 = vmatmul.mubr.msk.f32.vlgmr.msra.gmra.mxu1 %vm906_vm2, %v993_v45  ;;  %2050 = vmatpush3.msra.mxu0 %v1581_v23 }
 0x3a7   : > { %2016 = vmatpush3.xpose.msk.msra.mxu1 %vm906_vm2, %v1070_v37  ;;  %2017 = vmatprep.mubr.msk.f32.mxu1 %vm2499_vm0, %v2498_v0 }
 0x3a8   : > { %2020 = vmatprep.subr.mxu1 %v2498_v0  ;;  %2051 = vmatprep.subr.mxu0 %v2498_v0 }
 0x3a9   : > { %2052 = vmatpush3.msra.mxu0 %v1580_v24 }
 0x3aa   : > { %2018 = vmatmul.mubr.msk.f32.vlgmr.msra.gmra.mxu1 %vm906_vm2, %v1068_v38  ;;  %v1664_v38 = vld [vmem:[%s573_s9] sm:$0xff] }
 0x3ab   : > { %2022 = vmatprep.mubr.msk.f32.mxu1 %vm2499_vm0, %v2498_v0 }
 0x45d   : > { %v1307_v46 = vpop.f32.mrf.mxu0 }
 0x45e   : > { %v1311_v47 = vsel %vm906_vm2, %v1307_v46, -inf }
 0x45f   : > { %1312 = vmax.xlane.f32.xlu0 %v1311_v47  ;;  %v2029_v48 = vpop.f32.mrf.mxu0 }
 0x461   : > { %v1472_v49 = vpop.f32.mrf.mxu0 }
 0x462   : > { %v1476_v56 = vsel %vm906_vm2, %v1472_v49, -inf }
 0x463   : > { %v2039_v50 = vpop.f32.mrf.mxu0 }
 0x466   : > { %v2937_v51 = vpop.f32.mrf.mxu1 }
 0x468   : > { %v2014_v52 = vpop.f32.mrf.mxu1 }
 0x469   : > { %v1930_v52 = vld [vmem:[%s3095_s19] ss:$0 sm:$0xff] }
 0x46a   : > { %v1141_v53 = vpop.f32.mrf.mxu1 }
 0x46b   : > { %v1145_v54 = vsel %vm906_vm2, %v1141_v53, -inf }
 0x46c   : > { %1146 = vmax.xlane.f32.xlu1 %v1145_v54  ;;  %v2019_v55 = vpop.f32.mrf.mxu1  ;;  %v1931_v54 = vld [vmem:[%s3096_s24] ss:$0 sm:$0xff] }
 0x470   : > { %1477 = vmax.xlane.f32.xlu1 %v1476_v56 }
 0x4e8   : > { %v1313_v57 = vpop.xlane.xlu0 %1312 }
 0x4e9   : > { %v1314_v58 = vsub.f32 %v1307_v46, %v1313_v57 }
 0x4eb   : > { %v1315_v59 = vmul.f32 1.442695, %v1314_v58 }
 0x4ed   : > { %2172 = vpow2.f32 %v1315_v59 }
 0x4f5   : > { %v1147_v60 = vpop.xlane.xlu1 %1146 }
 0x4f6   : > { %v1148_v5 = vsub.f32 %v1141_v53, %v1147_v60 }
 0x4f8   : > { %v1149_v6 = vmul.f32 1.442695, %v1148_v5 }
 0x4f9   : > { %v1478_v61 = vpop.xlane.xlu1 %1477 }
 0x4fa   : > { %v2173_v62 = vpop.eup %2172  ;;  %v1479_v63 = vsub.f32 %v1472_v49, %v1478_v61 }
 0x4fb   : > { %v1317_v1 = vsel %vm906_vm2, %v2173_v62, 0.0 }
 0x4fc   : > { %v1480_v2 = vmul.f32 1.442695, %v1479_v63  ;;  %1318 = vadd.xlane.f32.xlu0 %v1317_v1 }
 0x4fe   : > { %2174 = vpow2.f32 %v1480_v2 }
 0x4ff   : > { %2176 = vpow2.f32 %v1149_v6 }
 0x50b   : > { %v2175_v3 = vpop.eup %2174 }
 0x50c   : > { %v1482_v4 = vsel %vm906_vm2, %v2175_v3, 0.0  ;;  %v2177_v7 = vpop.eup %2176 }
 0x50d   : > { %1483 = vadd.xlane.f32.xlu1 %v1482_v4  ;;  %v1151_v8 = vsel %vm906_vm2, %v2177_v7, 0.0 }
 0x512   : > { %1157 = vrot.lane.b32.xlu0 %v2913_v35, %s2500_s18  ;;  %s648_s18 = scalar_lea.vmem [#allocation16], %s2827_s28 }
 0x51e   : > { %1322 = vrot.lane.b32.xlu1 %v2913_v35, %s2501_s23  ;;  %s1711_s23 = sshll.u32 %s648_s18, 4  ;;  %s1712_s23 = int_to_ptr.vmem [resolvable:$true] %s1711_s23 }
 0x542   : > { %1152 = vadd.xlane.f32.xlu1 %v1151_v8 }
 0x553   : > { %1487 = vrot.lane.b32.xlu1 %v2913_v35, %s2502_s29 }
 0x585   : > { %v1319_v9 = vpop.xlane.xlu0 %1318 }
 0x589   : > { %v1158_v10 = vpop.permute.xlu0 %1157 }
 0x58a   : > { %2021 = vmatpush3.msra.mxu1 %v1158_v10 }
 0x58b   : > { %2030 = vmatprep.subr.mxu1 %v2498_v0 }
 0x596   : > { %v1484_v11 = vpop.xlane.xlu1 %1483 }
 0x59a   : > { %v1323_v12 = vpop.permute.xlu1 %1322 }
 0x5cb   : > { %v1153_v13 = vpop.xlane.xlu1 %1152 }
 0x5cc   : > { %2178 = vrcp.f32 %v1153_v13 }
 0x5cd   : > { %2180 = vrcp.f32 %v1319_v9 }
 0x5ce   : > { %2182 = vrcp.f32 %v1484_v11 }
 0x5cf   : > { %v1488_v19 = vpop.permute.xlu1 %1487 }
 0x5d9   : > { %v2179_v14 = vpop.eup %2178 }
 0x5da   : > { %v1155_v15 = vmul.f32 %v2179_v14, %v2177_v7  ;;  %v2181_v16 = vpop.eup %2180 }
 0x5db   : > { %v1321_v17 = vmul.f32 %v2181_v16, %v2173_v62  ;;  %v2183_v18 = vpop.eup %2182 }
 0x5dc   : > { %2023 = vmatmul.mubr.msk.f32.vlgmr.msra.gmra.mxu1 %vm906_vm2, %v1155_v15  ;;  %v1486_v20 = vmul.f32 %v2183_v18, %v2175_v3 }
 0x5dd   : > { %2031 = vmatpush3.msra.mxu1 %v1323_v12  ;;  %2032 = vmatprep.mubr.msk.f32.mxu1 %vm2499_vm0, %v2498_v0 }
 0x5de   : > { %2040 = vmatprep.subr.mxu1 %v2498_v0 }
 0x5e0   : > { %2033 = vmatmul.mubr.msk.f32.vlgmr.msra.gmra.mxu1 %vm906_vm2, %v1321_v17 }
 0x5e1   : > { %2041 = vmatpush3.msra.mxu1 %v1488_v19  ;;  %2042 = vmatprep.mubr.msk.f32.mxu1 %vm2499_vm0, %v2498_v0 }
 0x5e4   : > { %2043 = vmatmul.mubr.msk.f32.vlgmr.msra.gmra.mxu1 %vm906_vm2, %v1486_v20 }
 0x69c   : > { %v1229_v25 = vpop.f32.mrf.mxu1 }
 0x69d   : > { %1564 = vrot.lane.b32.xlu0 %v1229_v25, %s2503_s4  ;;  %s1698_s4 = scalar_lea.sflag [#allocation4], %s2824_s13 }
 0x69e   : > { %v2024_v26 = vpop.f32.mrf.mxu1 }
 0x6a0   : > { %v1394_v27 = vpop.f32.mrf.mxu1 }
 0x6a1   : > { %1568 = vrot.lane.b32.xlu1 %v1394_v27, %s2504_s5  ;;  %s2402_s5 = scalar_lea.vmem %s1712_s23, 128 }
 0x6a2   : > { %v2034_v28 = vpop.f32.mrf.mxu1  ;;  %p2403_p6 = scmp.ne.s32.totalorder %s1712_s23, %s2402_s5 }
 0x6a4   : > { %v1559_v29 = vpop.f32.mrf.mxu1  ;;  %p2404_p8 = pnand %p2403_p6, %p3098_p4 }
 0x6a5   : > { %1572 = vrot.lane.b32.xlu0 %v1559_v29, %s2505_s27  ;;  %s2506_s27 = smov [#allocation16]  }
 0x6a6   : > { %v2044_v30 = vpop.f32.mrf.mxu1  ;;  %p2405_p11 = pneg %p2404_p8  ;;  %s2406_s21 = sshll.u32 %s2506_s27, 4  ;;  %s2407_s21 = int_to_ptr.vmem [resolvable:$false] %s2406_s21 }
 0x6a7   : > { %s2408_s17 = scalar_lea.vmem %s2407_s21, 256  ;;  %p2409_p7 = scmp.lt.s32.totalorder %s1712_s23, %s2407_s21 }
 0x6a8   : > { %p2410_p2 = scmp.lt.s32.totalorder %s2408_s17, %s2402_s5 }
 0x6aa   : > { %p2411_p0 = por %p2410_p2, %p2409_p7 }
 0x6ac   : > { %p2412_p13 = pnand %p2411_p0, %p2405_p11 }
 0x70f   : > { %v1565_v31 = vpop.permute.xlu0 %1564 }
 0x710   : > { %v1575_v0 = vsel %vm906_vm2, %v2937_v51, %v1565_v31 }
 0x713   : > { %v1569_v32 = vpop.permute.xlu1 %1568 }
 0x714   : > { %v1577_v33 = vsel %vm1576_vm3, %v1575_v0, %v1569_v32 }
 0x717   : > { %v1573_v34 = vpop.permute.xlu0 %1572 }
 0x718   : > { %v1579_v35 = vsel %vm1578_vm4, %v1577_v33, %v1573_v34 }
 0x719   : > { %2054 = vmatmul.mubr.msk.f32.vlgmr.msra.gmra.mxu0 %vm663_vm1, %v1579_v35 }
 0x7d9   : > { %v1660_v37 = vpop.f32.mrf.mxu0 }
 0x7da   : > { %v1661_v39 = vadd.f32 %v1928_v36, %v1660_v37 }
 0x7db   : > { %v2055_v40 = vpop.f32.mrf.mxu0 }
 0x7dc   : > { %v1667_v41 = vadd.f32 %v1664_v38, %v1661_v39 }
 0x7de   : > { %v1668_v42 = vsel %vm663_vm1, %v1667_v41, 0.0 }
 0x7df   : > { %1669 = vadd.xlane.f32.xlu1 %v1668_v42 }
 0x868   : > { %v1670_v43 = vpop.xlane.xlu1 %1669 }
 0x869   : > { %v1672_v44 = vmul.f32 0.03125, %v1670_v43 }
 0x86b   : > { %v1673_v45 = vsub.f32 %v1667_v41, %v1672_v44 }
 0x86d   : > { %v1674_v46 = vmul.f32 %v1673_v45, %v1673_v45 }
 0x86f   : > { %v1675_v47 = vsel %vm663_vm1, %v1674_v46, 0.0 }
 0x870   : > { %1676 = vadd.xlane.f32.xlu0 %v1675_v47 }
 0x8f9   : > { %v1677_v48 = vpop.xlane.xlu0 %1676 }
 0x8fa   : > { %v1678_v49 = vmul.f32 0.03125, %v1677_v48 }
 0x8fc   : > { %v1679_v50 = vadd.f32 1e-05, %v1678_v49 }
 0x8fe   : > { %2184 = vrsqrt.f32 %v1679_v50 }
 0x90b   : > { %v2185_v51 = vpop.eup %2184 }
 0x90c   : > { %v1681_v53 = vmul.f32 %v2185_v51, %v1673_v45 }
 0x90e   : > { %v1688_v55 = vmul.f32 %v1930_v52, %v1681_v53 }
 0x910   : > { %v1695_v56 = vadd.f32 %v1931_v54, %v1688_v55 }
 0x912   : > { %1696 = vst.msk [vmem:[%s648_s18] sm:$0xff] %vm663_vm1, %v1695_v56 }
 0x913   : > { %2415 = shalt.err (!%p2412_p13)
}
 0x914   : > { %s2416_s28 = scalar_lea.hbm %s1709_s25, 128  ;;  %s2420_s12 = scalar_lea.hbm %s3097_s26, 256 }
 0x915   : > { %p2417_p9 = scmp.ne.s32.totalorder %s1709_s25, %s2416_s28  ;;  %p2421_p10 = scmp.lt.s32.totalorder %s1709_s25, %s3097_s26 }
 0x916   : > { %p2422_p5 = scmp.lt.s32.totalorder %s2420_s12, %s2416_s28 }
 0x917   : > { %p2418_p1 = pnand %p2417_p9, %p3098_p4 }
 0x918   : > { %p2423_p3 = por %p2422_p5, %p2421_p10 }
 0x919   : > { %p2419_p12 = pneg %p2418_p1 }
 0x91b   : > { %p2424_p6 = pnand %p2423_p3, %p2419_p12 }
 0x91d   : > { %2427 = shalt.err (!%p2424_p6)
}
 0x91e   : > { %2080 = dma.vmem_to_hbm [thread:$0]  (%p3098_p4), %s1712_s23, 128, %s1709_s25, %s1698_s4  }
 0x91f PF: > { %s3099_s19 = sld [smem:[#allocation24_spill]]  ;;  %p3102_p11 = scmp.ge.s32.totalorder %s2486_s16, 2 }
 0x920   : > { %s3100_s10 = sld [smem:[#allocation25_spill]] }
 0x925   : > { %s1723_s14 = sand.u32 1, %s3099_s19  }
 0x926   : > { %p3101_p8 = scmp.ne.s32.totalorder %s3100_s10, 0  ;;  %s1724_s24 = scalar_lea.sflag [#allocation4], %s1723_s14 }
 0x928   : > { %p2109_p7 = pnand %p3102_p11, %p3101_p8 }
 0x92a   : > { %p2110_p2 = pneg %p2109_p7 }
 0x92c   : > { %2469 = dma.done.wait (%p2110_p2), %s1724_s24, 128  }
 0x92d   : > { %2471 = vsyncadd (%p2110_p2), %s1724_s24, 4294967168  ;;  %s3103_s16 = sld [smem:[#allocation26_spill]]  ;;  %s3105_s29 = smov %s2478_s30 }
 0x92e   : > { %s3104_s11 = sld [smem:[#allocation28_spill]]  ;;  %s3106_s30 = smov %s2482_s15 }
 0x933   : > { %p35_p0 = scmp.ge.s32.totalorder %s3103_s16, 4  }
 0x934   : > { %s3107_s15 = smov %s3104_s11 }
 0x935   :  { %37 = sbr.rel (!%p35_p0) target bundleno = 22 (0x16), region = 174 }
 0x93a   :  { %1729 = vsyncpa [#allocation3], 1 }
 0x93b   :  { %1731 = vsyncpa [#allocation3 + $0x1], 1 }
 0x93c   :  { %1732 = vsyncpa [#allocation6], 1 }
 0x93d   :  { %1734 = vsyncpa [#allocation6 + $0x1], 1 }
 0x93e   :  { %1735 = vsyncpa [#allocation9], 1 }
 0x93f   :  { %1737 = vsyncpa [#allocation9 + $0x1], 1 }
 0x940   :  { %1738 = vsyncpa [#allocation12], 1 }
 0x941   :  { %1739 = vsyncpa [#allocation15], 1 }
 0x942   :  { %1740 = vsyncpa [#allocation4], 1 }
 0x943   :  { %1742 = vsyncpa [#allocation4 + $0x1], 1 }

</bundles_post_ra>
